<compile_context>
chip_gen: v6e
topology: v6e:2x2x1
jax: 0.10.0
libtpu: 0.0.40
codegen_flags: <defaults>
</compile_context>

<pallas_src>
import jax
import jax.numpy as jnp
from jax.experimental import pallas as pl
from jax.experimental.pallas import tpu as pltpu


def _bce_terms(logits, target):
    """Per-element BCE(sigmoid(logits), target) with PyTorch's -100 log clamp."""
    p = jax.nn.sigmoid(logits)
    t = target.astype(jnp.float32)
    log_p = jnp.maximum(jnp.log(p), -100.0)
    log_1mp = jnp.maximum(jnp.log(1.0 - p), -100.0)
    return -(t * log_p + (1.0 - t) * log_1mp)


def _mlp_stack(h, w_ref, nlayers):
    """Unrolled bias-free linear stack: h <- h @ W_l.T for l in range(nlayers)."""
    for l in range(nlayers):                        # static -> unrolls at trace time
        w = w_ref[l]                                # (out, in) nn.Linear layout
        h = jax.lax.dot_general(
            h.astype(w.dtype), w,
            dimension_numbers=(((1,), (1,)), ((), ())),   # h @ w.T, no transpose op
            preferred_element_type=jnp.float32)
    return h


# --------------------------------------------------------------------------- #
# Path 1: fused single-invocation kernel (tiny problems)
# --------------------------------------------------------------------------- #
def _mlp_bce_fused_kernel(x_ref, t_ref, w_ref, loss_ref):
    """No grid. x_ref/t_ref: (B, D) VMEM; w_ref: (L, D, D) VMEM; loss_ref: (1,) SMEM."""
    h = _mlp_stack(x_ref[...].astype(jnp.float32), w_ref, w_ref.shape[0])
    loss_ref[0] = jnp.mean(_bce_terms(h, t_ref[...]))


def _fused_call(x, target, weights):
    loss = pl.pallas_call(
        _mlp_bce_fused_kernel,
        out_shape=jax.ShapeDtypeStruct((1,), jnp.float32),
        in_specs=[
            pl.BlockSpec(memory_space=pltpu.MemorySpace.VMEM),
            pl.BlockSpec(memory_space=pltpu.MemorySpace.VMEM),
            pl.BlockSpec(memory_space=pltpu.MemorySpace.VMEM),
        ],
        out_specs=pl.BlockSpec(memory_space=pltpu.MemorySpace.SMEM),
    )(x, target, weights)
    return loss[0]


# --------------------------------------------------------------------------- #
# Path 2: batch-tiled kernel, weight stack resident in VMEM, grid = (batch_tiles,)
# --------------------------------------------------------------------------- #
def _mlp_bce_resident_kernel(x_ref, t_ref, w_ref, loss_ref):
    """x_ref/t_ref: (tb, D) blocks; w_ref: (L, D, D) full stack (constant index -> one DMA);
    loss_ref: (1, 8, 128) lane-dense per-tile partial-sum block."""
    h = _mlp_stack(x_ref[...].astype(jnp.float32), w_ref, w_ref.shape[0])
    tile_sum = jnp.sum(_bce_terms(h, t_ref[...]))
    loss_ref[...] = jnp.full(loss_ref.shape, tile_sum, dtype=loss_ref.dtype)


def _resident_call(x, target, weights, batch_tile):
    B, D = x.shape
    nlayers = weights.shape[0]
    assert B % batch_tile == 0, (B, batch_tile)
    nb = B // batch_tile

    partial = pl.pallas_call(
        _mlp_bce_resident_kernel,
        out_shape=jax.ShapeDtypeStruct((nb, 8, 128), jnp.float32),
        grid_spec=pltpu.PrefetchScalarGridSpec(
            num_scalar_prefetch=0,
            grid=(nb,),
            in_specs=[
                pl.BlockSpec((batch_tile, D), lambda b: (b, 0)),          # input tile
                pl.BlockSpec((batch_tile, D), lambda b: (b, 0)),          # target tile
                # Full weight stack, constant block index -> fetched from HBM once,
                # reused by every batch tile (vs. nb re-streams in a (b, l) grid).
                pl.BlockSpec((nlayers, D, D), lambda b: (0, 0, 0)),
            ],
            out_specs=pl.BlockSpec((1, 8, 128), lambda b: (b, 0, 0)),
        ),
        compiler_params=pltpu.CompilerParams(
            dimension_semantics=("parallel",),          # shard tiles across TCs on v7x
            vmem_limit_bytes=48 * 1024 * 1024,
        ),
    )(x, target, weights)

    return jnp.sum(partial[:, 0, 0]) / jnp.float32(B * D)


# --------------------------------------------------------------------------- #
# Path 3: layer-streamed kernel, grid = (batch_tiles ["parallel"], nlayers ["arbitrary"])
# --------------------------------------------------------------------------- #
def _mlp_bce_streamed_kernel(x_ref, t_ref, w_ref, loss_ref, acc_ref):
    """x_ref/t_ref: (tb, D) blocks (block index constant over the layer axis -> no re-DMA)
    w_ref:    (1, D, D) current layer's weight in nn.Linear (out, in) layout
    loss_ref: (1, 8, 128) per-batch-tile lane-dense output block
    acc_ref:  (tb, D) f32 VMEM scratch carrying activations across layers."""
    layer = pl.program_id(1)

    @pl.when(layer == 0)
    def _():
        acc_ref[...] = x_ref[...].astype(jnp.float32)

    w = w_ref[0]                                # (out, in)
    acc_ref[...] = jax.lax.dot_general(
        acc_ref[...].astype(w.dtype), w,
        dimension_numbers=(((1,), (1,)), ((), ())),       # acc @ w.T
        preferred_element_type=jnp.float32)

    @pl.when(layer == pl.num_programs(1) - 1)
    def _():
        tile_sum = jnp.sum(_bce_terms(acc_ref[...], t_ref[...]))
        loss_ref[...] = jnp.full(loss_ref.shape, tile_sum, dtype=loss_ref.dtype)


def _streamed_call(x, target, weights, batch_tile):
    B, D = x.shape
    nlayers = weights.shape[0]
    assert B % batch_tile == 0, (B, batch_tile)
    nb = B // batch_tile

    partial = pl.pallas_call(
        _mlp_bce_streamed_kernel,
        out_shape=jax.ShapeDtypeStruct((nb, 8, 128), jnp.float32),
        grid_spec=pltpu.PrefetchScalarGridSpec(
            num_scalar_prefetch=0,
            grid=(nb, nlayers),
            in_specs=[
                pl.BlockSpec((batch_tile, D), lambda b, l: (b, 0)),   # input tile
                pl.BlockSpec((batch_tile, D), lambda b, l: (b, 0)),   # target tile
                # Per-layer weight streamed in native (out, in) layout (no transpose).
                # TODO(synk): N-tile this block ((1, D, tn) + ping-pong activation scratch)
                # once a single 2 * D*D*itemsize layer no longer fits the VMEM budget.
                pl.BlockSpec((1, D, D), lambda b, l: (l, 0, 0)),
            ],
            out_specs=pl.BlockSpec((1, 8, 128), lambda b, l: (b, 0, 0)),
            scratch_shapes=[pltpu.VMEM((batch_tile, D), jnp.float32)],
        ),
        compiler_params=pltpu.CompilerParams(
            dimension_semantics=("parallel", "arbitrary"),
            vmem_limit_bytes=48 * 1024 * 1024,
        ),
    )(x, target, weights)

    return jnp.sum(partial[:, 0, 0]) / jnp.float32(B * D)


# --------------------------------------------------------------------------- #
# Dispatcher
# --------------------------------------------------------------------------- #
def mix_module_mlp_with_loss(x, target, weights, *, weights_dtype=None,
                             batch_tile=None, path=None):
    """x, target: (B, D).  weights: (nlayers, D, D) in nn.Linear (out, in) layout.

    weights_dtype: optional streaming dtype for the weights (e.g. jnp.bfloat16);
                   activations accumulate in f32 either way.
    batch_tile:    batch tile for the tiled paths (must divide B; multiple of 8 unless == B).
    path:          None (auto) | "fused" | "resident" | "streamed".
    """
    B, D = x.shape
    if weights_dtype is not None:
        weights = weights.astype(weights_dtype)

    weight_bytes = weights.size * weights.dtype.itemsize
    act_bytes = B * D * 4

    if path is None:
        if batch_tile is None and weight_bytes <= 4 * 1024 * 1024 and act_bytes <= 2 * 1024 * 1024:
            path = "fused"
        elif weight_bytes <= 6 * 1024 * 1024:
            path = "resident"      # whole weight stack stays in VMEM, one HBM fetch
        else:
            path = "streamed"      # stream one layer per inner grid step

    if path == "fused":
        return _fused_call(x, target, weights)

    if batch_tile is None:
        batch_tile = B
        for cand in (512, 256, 128, 64, 32, 16, 8):
            if B % cand == 0:
                batch_tile = cand
                break

    if path == "resident":
        return _resident_call(x, target, weights, batch_tile)
    return _streamed_call(x, target, weights, batch_tile)


def reference_loss(x, target, weights):
    h = x.astype(jnp.float32)
    for l in range(weights.shape[0]):
        h = h @ weights[l].T
    p = jax.nn.sigmoid(h)
    log_p = jnp.maximum(jnp.log(p), -100.0)
    log_1mp = jnp.maximum(jnp.log(1.0 - p), -100.0)
    return jnp.mean(-(target * log_p + (1.0 - target) * log_1mp))


if __name__ == "__main__":
    key = jax.random.PRNGKey(0)
    k = jax.random.split(key, 6)

    # --- Case 1: module-consistent small shapes -> fused single-step path ---
    batch, dim, nlayers = 8, 32, 3
    x = jax.random.normal(k[0], (batch, dim), dtype=jnp.float32)
    target = jax.random.uniform(k[1], (batch, dim), dtype=jnp.float32)   # BCE targets in [0,1]
    bound = 1.0 / jnp.sqrt(jnp.float32(dim))
    weights = jax.random.uniform(k[2], (nlayers, dim, dim), dtype=jnp.float32,
                                 minval=-bound, maxval=bound)

    loss = jax.block_until_ready(jax.jit(mix_module_mlp_with_loss)(x, target, weights))
    ref = reference_loss(x, target, weights)
    assert jnp.allclose(loss, ref, rtol=1e-5, atol=1e-5), (loss, ref)

    # --- Case 2: batch-tiled path with the weight stack resident in VMEM ---
    B2, D2, L2 = 32, 128, 3
    x2 = jax.random.normal(k[3], (B2, D2), dtype=jnp.float32)
    t2 = jax.random.uniform(k[4], (B2, D2), dtype=jnp.float32)
    b2 = 1.0 / jnp.sqrt(jnp.float32(D2))
    w2 = jax.random.uniform(k[5], (L2, D2, D2), dtype=jnp.float32, minval=-b2, maxval=b2)
    ref2 = reference_loss(x2, t2, w2)

    resident = jax.jit(lambda a, b, c: mix_module_mlp_with_loss(
        a, b, c, batch_tile=8, path="resident"))
    loss2 = jax.block_until_ready(resident(x2, t2, w2))
    assert jnp.allclose(loss2, ref2, rtol=1e-4, atol=1e-4), (loss2, ref2)

    # --- Case 3: layer-streamed path (batch-parallel x layer grid), f32 weights ---
    streamed = jax.jit(lambda a, b, c: mix_module_mlp_with_loss(
        a, b, c, batch_tile=8, path="streamed"))
    loss3 = jax.block_until_ready(streamed(x2, t2, w2))
    assert jnp.allclose(loss3, ref2, rtol=1e-4, atol=1e-4), (loss3, ref2)

    # --- Case 4: streamed path with bf16 weight streaming (f32 accumulator) ---
    streamed_bf16 = jax.jit(lambda a, b, c: mix_module_mlp_with_loss(
        a, b, c, weights_dtype=jnp.bfloat16, batch_tile=8, path="streamed"))
    loss4 = jax.block_until_ready(streamed_bf16(x2, t2, w2))
    assert bool(jnp.isfinite(loss4)), loss4
    assert abs(float(loss4) - float(ref2)) < 5e-2 * abs(float(ref2)) + 1e-2, (loss4, ref2)

    print("KERNEL_OK")
</pallas_src>

<mosaic_0001>
module attributes {stable_mosaic.version = 11 : i64} {
  func.func @_mlp_bce_fused_kernel(%arg0: memref<8x32xf32, #tpu.memory_space<vmem>>, %arg1: memref<8x32xf32, #tpu.memory_space<vmem>>, %arg2: memref<3x32x32xf32, #tpu.memory_space<vmem>>, %arg3: memref<1xf32, #tpu.memory_space<smem>>) attributes {dimension_semantics = [], scalar_prefetch = 0 : i64, scratch_operands = 0 : i64, tpu.core_type = #tpu.core_type<tc>} {
    %c0 = arith.constant 0 : index
    %c0_0 = arith.constant 0 : index
    %0 = vector.load %arg0[%c0, %c0_0] : memref<8x32xf32, #tpu.memory_space<vmem>>, vector<8x32xf32>
    %c0_1 = arith.constant 0 : index
    %c0_2 = arith.constant 0 : index
    %c0_3 = arith.constant 0 : index
    %1 = vector.load %arg2[%c0_1, %c0_2, %c0_3] : memref<3x32x32xf32, #tpu.memory_space<vmem>>, vector<1x32x32xf32>
    %2 = vector.shape_cast %1 : vector<1x32x32xf32> to vector<32x32xf32>
    %cst = arith.constant dense<0.000000e+00> : vector<8x32xf32>
    %3 = tpu.matmul %0, %2, %cst {dimension_numbers = #tpu.dot_dimension_numbers<[1], [1], [0], [0], [0, 0, 1, 0], [], []>} : vector<8x32xf32>, vector<32x32xf32>, vector<8x32xf32> -> vector<8x32xf32>
    %c1 = arith.constant 1 : index
    %c0_4 = arith.constant 0 : index
    %c0_5 = arith.constant 0 : index
    %4 = vector.load %arg2[%c1, %c0_4, %c0_5] : memref<3x32x32xf32, #tpu.memory_space<vmem>>, vector<1x32x32xf32>
    %5 = vector.shape_cast %4 : vector<1x32x32xf32> to vector<32x32xf32>
    %cst_6 = arith.constant dense<0.000000e+00> : vector<8x32xf32>
    %6 = tpu.matmul %3, %5, %cst_6 {dimension_numbers = #tpu.dot_dimension_numbers<[1], [1], [0], [0], [0, 0, 1, 0], [], []>} : vector<8x32xf32>, vector<32x32xf32>, vector<8x32xf32> -> vector<8x32xf32>
    %c2 = arith.constant 2 : index
    %c0_7 = arith.constant 0 : index
    %c0_8 = arith.constant 0 : index
    %7 = vector.load %arg2[%c2, %c0_7, %c0_8] : memref<3x32x32xf32, #tpu.memory_space<vmem>>, vector<1x32x32xf32>
    %8 = vector.shape_cast %7 : vector<1x32x32xf32> to vector<32x32xf32>
    %cst_9 = arith.constant dense<0.000000e+00> : vector<8x32xf32>
    %9 = tpu.matmul %6, %8, %cst_9 {dimension_numbers = #tpu.dot_dimension_numbers<[1], [1], [0], [0], [0, 0, 1, 0], [], []>} : vector<8x32xf32>, vector<32x32xf32>, vector<8x32xf32> -> vector<8x32xf32>
    %c0_10 = arith.constant 0 : index
    %c0_11 = arith.constant 0 : index
    %10 = vector.load %arg1[%c0_10, %c0_11] : memref<8x32xf32, #tpu.memory_space<vmem>>, vector<8x32xf32>
    %11 = arith.negf %9 : vector<8x32xf32>
    %12 = math.exp %11 : vector<8x32xf32>
    %cst_12 = arith.constant 1.000000e+00 : f32
    %13 = vector.broadcast %cst_12 : f32 to vector<8x32xf32>
    %14 = arith.addf %13, %12 : vector<8x32xf32>
    %15 = arith.divf %13, %14 : vector<8x32xf32>
    %16 = math.log %15 : vector<8x32xf32>
    %cst_13 = arith.constant -1.000000e+02 : f32
    %17 = vector.broadcast %cst_13 : f32 to vector<8x32xf32>
    %18 = arith.maximumf %16, %17 : vector<8x32xf32>
    %cst_14 = arith.constant 1.000000e+00 : f32
    %19 = vector.broadcast %cst_14 : f32 to vector<8x32xf32>
    %20 = arith.subf %19, %15 : vector<8x32xf32>
    %21 = math.log %20 : vector<8x32xf32>
    %cst_15 = arith.constant -1.000000e+02 : f32
    %22 = vector.broadcast %cst_15 : f32 to vector<8x32xf32>
    %23 = arith.maximumf %21, %22 : vector<8x32xf32>
    %24 = arith.mulf %10, %18 : vector<8x32xf32>
    %cst_16 = arith.constant 1.000000e+00 : f32
    %25 = vector.broadcast %cst_16 : f32 to vector<8x32xf32>
    %26 = arith.subf %25, %10 : vector<8x32xf32>
    %27 = arith.mulf %26, %23 : vector<8x32xf32>
    %28 = arith.addf %24, %27 : vector<8x32xf32>
    %cst_17 = arith.constant 0.000000e+00 : f32
    %29 = vector.broadcast %cst_17 : f32 to vector<8x32xf32>
    %30 = arith.subf %29, %28 : vector<8x32xf32>
    %31 = vector.shape_cast %30 : vector<8x32xf32> to vector<1x8x32xf32>
    %cst_18 = arith.constant dense<0.000000e+00> : vector<1xf32>
    %32 = vector.multi_reduction <add>, %31, %cst_18 [1, 2] : vector<1x8x32xf32> to vector<1xf32>
    %33 = vector.shape_cast %32 : vector<1xf32> to vector<1x1x1xf32>
    %34 = vector.extract %33[0, 0, 0] : f32 from vector<1x1x1xf32>
    %cst_19 = arith.constant 2.560000e+02 : f32
    %35 = arith.divf %34, %cst_19 : f32
    %c0_20 = arith.constant 0 : index
    %36 = memref.load %arg3[%c0_20] : memref<1xf32, #tpu.memory_space<smem>>
    memref.store %35, %arg3[%c0_20] : memref<1xf32, #tpu.memory_space<smem>>
    return
  }
}

</mosaic_0001>

<bundles_post_ra>
// kernel: mix_module_mlp_with_loss.1
= control target key start
LH: loop header
LB: loop body
LE: loop exit
PB: predicated region body
PF: predicated region fallthrough
CT: control target
= control target key end

     0   :  { %8 = vsyncpa [#allocation3], 0  ;;  %s587_s0 = inlined_call_operand.hbm [shape: f32[8,32], index: 0, kind: input, shape index: {}]   ;;  %s588_s1 = inlined_call_operand.hbm [shape: f32[8,32], index: 1, kind: input, shape index: {}]   ;;  %s589_s2 = inlined_call_operand.hbm [shape: f32[3,32,32], index: 2, kind: input, shape index: {}]   ;;  %s590_s3 = inlined_call_operand.hbm [shape: f32[1], index: 3, kind: output, shape index: {}]  }
   0x1   :  { %9 = vsyncpa [#allocation6], 0 }
   0x2   :  { %10 = vsyncpa [#allocation4], 0  ;;  %s528_s12 = smov [#allocation5]   ;;  %s529_s14 = smov [#allocation2]  }
   0x3   :  { %s27_s13 = sshll.u32 %s528_s12, 4  ;;  %s17_s15 = sshll.u32 %s529_s14, 4  ;;  %s28_s13 = int_to_ptr.vmem [resolvable:$true] %s27_s13  ;;  %s18_s15 = int_to_ptr.vmem [resolvable:$true] %s17_s15 }
   0x4   :  { %s462_s16 = scalar_lea.vmem %s28_s13, 128  ;;  %p467_p1 = scmp.lt.s32.totalorder %s28_s13, %s28_s13 }
   0x5   :  { %p463_p0 = scmp.ne.s32.totalorder %s28_s13, %s462_s16  ;;  %p468_p2 = scmp.lt.s32.totalorder %s462_s16, %s462_s16 }
   0x7   :  { %p469_p3 = por %p468_p2, %p467_p1 }
   0x9   :  { %p470_p4 = pnand %p469_p3, %p463_p0 }
   0xb   :  { %473 = shalt.err (!%p470_p4)
}
   0xc   :  { %30 = dma.hbm_to_vmem [thread:$0]  %s588_s1, 128, %s28_s13, [#allocation6]  }
   0xd   :  { %s482_s19 = scalar_lea.vmem %s18_s15, 128  ;;  %p487_p6 = scmp.lt.s32.totalorder %s18_s15, %s18_s15 }
   0xe   :  { %p483_p5 = scmp.ne.s32.totalorder %s18_s15, %s482_s19  ;;  %p488_p7 = scmp.lt.s32.totalorder %s482_s19, %s482_s19 }
  0x10   :  { %p489_p8 = por %p488_p7, %p487_p6 }
  0x12   :  { %p490_p9 = pnand %p489_p8, %p483_p5 }
  0x14   :  { %493 = shalt.err (!%p490_p9)
}
  0x15   :  { %20 = dma.hbm_to_vmem [thread:$0]  %s587_s0, 128, %s18_s15, [#allocation3]  }
  0x16   :  { %s530_s22 = smov [#allocation7]  }
  0x17   :  { %s36_s23 = sshll.u32 %s530_s22, 4  ;;  %s37_s23 = int_to_ptr.vmem [resolvable:$true] %s36_s23 }
  0x18   :  { %s502_s24 = scalar_lea.vmem %s37_s23, 1536  ;;  %p507_p11 = scmp.lt.s32.totalorder %s37_s23, %s37_s23 }
  0x19   :  { %p503_p10 = scmp.ne.s32.totalorder %s37_s23, %s502_s24  ;;  %p508_p12 = scmp.lt.s32.totalorder %s502_s24, %s502_s24 }
  0x1b   :  { %p509_p13 = por %p508_p12, %p507_p11 }
  0x1d   :  { %p510_p0 = pnand %p509_p13, %p503_p10 }
  0x1f   :  { %513 = shalt.err (!%p510_p0)
}
  0x20   :  { %s531_s1 = smov 128   ;;  %s532_s25 = smov 8  }
  0x21   :  { %42 = dma.hbm_to_vmem [thread:$0]  %s589_s2, 1536, %s37_s23, [#allocation6], %s531_s1, %s531_s1, %s532_s25  }
  0x22   :  { %522 = dma.done.wait [#allocation3], 128  }
  0x23   :  { %523 = vsyncadd [#allocation3], 4294967168 }
  0x24   :  { %524 = dma.done.wait [#allocation6], 1664  }
  0x25   :  { %525 = vsyncadd [#allocation6], 4294965632  ;;  %v533_v0 = vmov 0.0   ;;  %vm534_vm0 = vmmov 0   ;;  %vm57_vm1 = vcmask 261120   ;;  %v56_v1 = vld [vmem:[#allocation7 + $0x18] sm:$0xff] }
  0x26   :  { %403 = vmatprep.subr.mxu0 %v533_v0  ;;  %411 = vmatprep.mubr.msk.f32.mxu0 %vm534_vm0, %v533_v0  ;;  %v147_v2 = vld [vmem:[#allocation7 + $0x38] sm:$0xff]  ;;  %v55_v3 = vld [vmem:[#allocation7 + $0x10] sm:$0xff]  ;;  %v54_v5 = vld [vmem:[#allocation7 + $0x8] sm:$0xff]  ;;  %s535_s28 = smov [#allocation8]  }
  0x27   :  { %414 = vmatprep.subr.mxu1 %v533_v0  ;;  %422 = vmatprep.mubr.msk.f32.mxu1 %vm534_vm0, %v533_v0  ;;  %v146_v4 = vld [vmem:[#allocation7 + $0x30] sm:$0xff]  ;;  %v145_v6 = vld [vmem:[#allocation7 + $0x28] sm:$0xff]  ;;  %v53_v7 = vld [vmem:[#allocation7] sm:$0xff] }
  0x28   :  { %404 = vmatpush3.xpose.msk.msra.mxu0 %vm57_vm1, %v56_v1  ;;  %415 = vmatpush3.xpose.msk.msra.mxu1 %vm57_vm1, %v147_v2  ;;  %v144_v8 = vld [vmem:[#allocation7 + $0x20] sm:$0xff]  ;;  %v52_v9 = vld [vmem:[#allocation2] sm:$0xff]  ;;  %v237_v10 = vld [vmem:[#allocation7 + $0x58] sm:$0xff] }
  0x29   :  { %405 = vmatprep.subr.mxu0 %v533_v0  ;;  %416 = vmatprep.subr.mxu1 %v533_v0  ;;  %v236_v11 = vld [vmem:[#allocation7 + $0x50] sm:$0xff]  ;;  %v235_v12 = vld [vmem:[#allocation7 + $0x48] sm:$0xff]  ;;  %v234_v13 = vld [vmem:[#allocation7 + $0x40] sm:$0xff] }
  0x2a   :  { %v323_v26 = vld [vmem:[#allocation5] sm:$0xff] }
  0x2b   :  { %v338_v31 = vsub.f32 1.0, %v323_v26 }
  0x2c   :  { %406 = vmatpush3.xpose.msk.msra.mxu0 %vm57_vm1, %v55_v3  ;;  %417 = vmatpush3.xpose.msk.msra.mxu1 %vm57_vm1, %v146_v4 }
  0x2d   :  { %407 = vmatprep.subr.mxu0 %v533_v0  ;;  %418 = vmatprep.subr.mxu1 %v533_v0 }
  0x30   :  { %408 = vmatpush3.xpose.msk.msra.mxu0 %vm57_vm1, %v54_v5  ;;  %419 = vmatpush3.xpose.msk.msra.mxu1 %vm57_vm1, %v145_v6 }
  0x31   :  { %409 = vmatprep.subr.mxu0 %v533_v0  ;;  %420 = vmatprep.subr.mxu1 %v533_v0 }
  0x34   :  { %410 = vmatpush3.xpose.msk.msra.mxu0 %vm57_vm1, %v53_v7  ;;  %421 = vmatpush3.xpose.msk.msra.mxu1 %vm57_vm1, %v144_v8 }
  0x35   :  { %425 = vmatprep.subr.mxu0 %v533_v0 }
  0x37   :  { %412 = vmatmul.mubr.msk.f32.vlgmr.msra.gmra.mxu0 %vm57_vm1, %v52_v9 }
  0x38   :  { %433 = vmatprep.mubr.msk.f32.mxu0 %vm534_vm0, %v533_v0  ;;  %426 = vmatpush3.xpose.msk.msra.mxu0 %vm57_vm1, %v237_v10 }
  0x39   :  { %427 = vmatprep.subr.mxu0 %v533_v0 }
  0x3c   :  { %428 = vmatpush3.xpose.msk.msra.mxu0 %vm57_vm1, %v236_v11 }
  0x3d   :  { %429 = vmatprep.subr.mxu0 %v533_v0 }
  0x40   :  { %430 = vmatpush3.xpose.msk.msra.mxu0 %vm57_vm1, %v235_v12 }
  0x41   :  { %431 = vmatprep.subr.mxu0 %v533_v0 }
  0x44   :  { %432 = vmatpush3.xpose.msk.msra.mxu0 %vm57_vm1, %v234_v13 }
  0xf7   :  { %v139_v14 = vpop.f32.mrf.mxu0 }
  0xf8   :  { %423 = vmatmul.mubr.msk.f32.vlgmr.msra.gmra.mxu1 %vm57_vm1, %v139_v14 }
  0xf9   :  { %v413_v15 = vpop.f32.mrf.mxu0 }
 0x1b8   :  { %v229_v16 = vpop.f32.mrf.mxu1 }
 0x1b9   :  { %434 = vmatmul.mubr.msk.f32.vlgmr.msra.gmra.mxu0 %vm57_vm1, %v229_v16 }
 0x1ba   :  { %v424_v17 = vpop.f32.mrf.mxu1 }
 0x279   :  { %v319_v18 = vpop.f32.mrf.mxu0 }
 0x27a   :  { %v387_v19 = vmul.f32 -1.442695, %v319_v18 }
 0x27b   :  { %v435_v20 = vpop.f32.mrf.mxu0 }
 0x27c   :  { %446 = vpow2.f32 %v387_v19 }
 0x289   :  { %v447_v21 = vpop.eup %446 }
 0x28a   :  { %v327_v22 = vadd.f32 1.0, %v447_v21 }
 0x28c   :  { %448 = vrcp.f32 %v327_v22 }
 0x299   :  { %v449_v23 = vpop.eup %448 }
 0x29a   :  { %450 = vlog2.f32 %v449_v23  ;;  %v333_v24 = vsub.f32 1.0, %v449_v23 }
 0x29c   :  { %452 = vlog2.f32 %v333_v24 }
 0x2a7   :  { %v451_v25 = vpop.eup %450 }
 0x2a8   :  { %v331_v27 = vmul.f32 0.6931472, %v451_v25 }
 0x2a9   :  { %v453_v28 = vpop.eup %452 }
 0x2aa   :  { %v332_v29 = vmax.f32 %v331_v27, -100.0  ;;  %v335_v30 = vmul.f32 0.6931472, %v453_v28 }
 0x2ac   :  { %v336_v32 = vmax.f32 %v335_v30, -100.0  ;;  %v337_v33 = vmul.f32 %v332_v29, %v323_v26 }
 0x2ae   :  { %v339_v34 = vmul.f32 %v338_v31, %v336_v32 }
 0x2b0   :  { %v340_v35 = vadd.f32 %v339_v34, %v337_v33 }
 0x2b2   :  { %v341_v36 = vsub.f32 0.0, %v340_v35 }
 0x2b4   :  { %v342_v37 = vsel %vm57_vm1, %v341_v36, 0.0 }
 0x2b5   :  { %343 = vadd.xlane.f32.xlu0 %v342_v37 }
 0x33e   :  { %v344_v38 = vpop.xlane.xlu0 %343 }
 0x33f   :  { %v345_v39 = vrot.slane %v344_v38, 4 }
 0x341   :  { %v346_v40 = vadd.f32 %v345_v39, %v344_v38 }
 0x343   :  { %v347_v41 = vrot.slane %v346_v40, 2 }
 0x345   :  { %v348_v42 = vadd.f32 %v347_v41, %v346_v40 }
 0x347   :  { %v349_v43 = vrot.slane %v348_v42, 1 }
 0x349   :  { %v350_v44 = vadd.f32 %v349_v43, %v348_v42 }
 0x34b   :  { %436 = vpush %v350_v44 }
 0x37c   :  { %s437_s0 = spop %436 }
 0x37d   :  { %s354_s2 = smul.f32 0.00390625, %s437_s0 }
 0x37f   :  { %356 = sst [smem:[#allocation8]] %s354_s2 }
 0x380   :  { %364 = dma.smem_to_hbm %s535_s28, 16, %s590_s3, [#allocation4]  }
 0x381   :  { %526 = dma.done.wait [#allocation4], 16  }
 0x382   :  { %527 = vsyncadd [#allocation4], 4294967280 }
 0x383   :  { %368 = sfence }
 0x384   :  { %369 = vsyncpa [#allocation3], 1 }
 0x385   :  { %370 = vsyncpa [#allocation6], 1 }
 0x386   :  { %371 = vsyncpa [#allocation4], 1 }

</bundles_post_ra>
